<compile_context>
chip_gen: v5e
topology: v5e:2x2
jax: 0.10.0
libtpu: 0.0.40
codegen_flags: <defaults>
</compile_context>

<pallas_src>
import jax
import jax.numpy as jnp
from jax.experimental import pallas as pl
from jax.experimental.pallas import tpu as pltpu


def _round_up(x, m):
    return ((x + m - 1) // m) * m


def _choose_tb(batch, tb_max=128):
    """Large batch tile (multiple of 8), but keep >= 2 grid steps for v7x megacore."""
    tb = min(tb_max, _round_up(batch, 8))
    if batch > 8:
        tb = min(tb, _round_up((batch + 1) // 2, 8))
    return max(8, tb)


def _compiler_params(vmem_estimate_bytes):
    kwargs = dict(dimension_semantics=("parallel",))
    if vmem_estimate_bytes > (12 << 20):
        kwargs["vmem_limit_bytes"] = int(min(vmem_estimate_bytes + (4 << 20), 48 << 20))
    return pltpu.CompilerParams(**kwargs)


# ----------------------------------------------------------------------------
# Streaming path (small T): BlockSpec-pipelined (tb, T, D) slab + in-VMEM select
# ----------------------------------------------------------------------------
def _most_recent_stream_kernel(msr_ref, cur_ref, enc_ref, out_ref):
    # msr_ref: (tb, 1) int32; -1 => no sibling (or padded row) -> contributes zero
    # cur_ref: (tb, D), enc_ref: (tb, T, D), out_ref: (tb, D)
    tb, t, d = enc_ref.shape
    t_iota = jax.lax.broadcasted_iota(jnp.int32, (tb, t, d), 1)
    sel = t_iota == msr_ref[...][:, :, None]                      # one-hot over T
    enc_sib = jnp.sum(jnp.where(sel, enc_ref[...], 0), axis=1)    # exact row select
    out_ref[...] = cur_ref[...] + enc_sib.astype(out_ref.dtype)


def _forward_stream(current_node, encoded_input, msr_sel, tb):
    B, T, D = encoded_input.shape
    dtype = current_node.dtype
    Bp = _round_up(B, tb)
    pad = Bp - B
    cur_p = jnp.pad(current_node, ((0, pad), (0, 0))) if pad else current_node
    enc_p = jnp.pad(encoded_input, ((0, pad), (0, 0), (0, 0))) if pad else encoded_input
    msr_p = jnp.pad(msr_sel, (0, pad), constant_values=-1) if pad else msr_sel

    est = (2 * tb * T * D * jnp.dtype(encoded_input.dtype).itemsize
           + 4 * tb * D * jnp.dtype(dtype).itemsize
           + 2 * tb * 128 * 4)

    grid_spec = pltpu.PrefetchScalarGridSpec(
        num_scalar_prefetch=0,
        grid=(Bp // tb,),
        in_specs=[
            pl.BlockSpec((tb, 1), lambda i: (i, 0)),        # msr index (-1 = gated)
            pl.BlockSpec((tb, D), lambda i: (i, 0)),        # current_node
            pl.BlockSpec((tb, T, D), lambda i: (i, 0, 0)),  # encoded_input slab
        ],
        out_specs=pl.BlockSpec((tb, D), lambda i: (i, 0)),
    )
    out = pl.pallas_call(
        _most_recent_stream_kernel,
        out_shape=jax.ShapeDtypeStruct((Bp, D), dtype),
        grid_spec=grid_spec,
        compiler_params=_compiler_params(est),
    )(msr_p.reshape(Bp, 1), cur_p, enc_p)
    return out[:B]


# ----------------------------------------------------------------------------
# Gather path (large T): manual HBM row gather, one semaphore + aggregate wait
# ----------------------------------------------------------------------------
def _most_recent_gather_kernel(idx_ref, cur_ref, gate_ref, enc_hbm, out_ref, gbuf, sem):
    # idx_ref : SMEM (Bp,) int32 flat row index into encoded_input.reshape(B*T, D)
    # cur_ref : VMEM (tb, D);  gate_ref: VMEM (tb, 1), 1.0 iff >= 1 sibling
    # enc_hbm : HBM (B*T, D) raw ref;  out_ref: VMEM (tb, D)
    # gbuf    : VMEM (tb, D) scratch;  sem: single DMA semaphore (shape (1,))
    i = pl.program_id(0)
    tb, _ = gbuf.shape
    base = i * tb

    def start_row(r):
        row = idx_ref[base + r]
        pltpu.make_async_copy(
            enc_hbm.at[pl.ds(row, 1), :],
            gbuf.at[pl.ds(r, 1), :],
            sem.at[0],
        ).start()

    if tb <= 32:
        for r in range(tb):            # static unroll: full LLO scheduling visibility
            start_row(r)
    else:
        @pl.loop(0, tb)                # bounded code size for large batch tiles
        def _(r):
            start_row(r)

    # All tb row copies signal the same semaphore with D*itemsize bytes each; one
    # aggregate wait sized (tb, D) matches the total byte count exactly.
    pltpu.make_async_copy(enc_hbm.at[pl.ds(0, tb), :], gbuf, sem.at[0]).wait()

    # out = current_node + gate * most_recent_sibling_encoding
    out_ref[...] = cur_ref[...] + gate_ref[...] * gbuf[...].astype(out_ref.dtype)


def _forward_gather(current_node, encoded_input, msr, has_sib, tb):
    B, T, D = encoded_input.shape
    dtype = current_node.dtype
    tb = max(8, min(tb, (B * T) // 8 * 8))   # aggregate-wait descriptor needs tb <= B*T rows

    enc_flat = encoded_input.reshape(B * T, D)            # contiguous, no copy
    # Inputs are assumed in-range (PyTorch would raise otherwise); the clamp only
    # keeps the HBM gather in-bounds for gated rows, whose result is zeroed anyway.
    msr_safe = jnp.clip(msr, 0, T - 1)
    flat_idx = (jnp.arange(B, dtype=jnp.int32) * T + msr_safe).astype(jnp.int32)
    gate = has_sib.astype(dtype)

    Bp = _round_up(B, tb)
    pad = Bp - B
    cur_p = jnp.pad(current_node, ((0, pad), (0, 0))) if pad else current_node
    gate_p = jnp.pad(gate, (0, pad)) if pad else gate
    idx_p = jnp.pad(flat_idx, (0, pad)) if pad else flat_idx  # padded rows: gather row 0, gated to 0, sliced off

    est = 5 * tb * D * jnp.dtype(dtype).itemsize + 2 * tb * 128 * 4

    grid_spec = pltpu.PrefetchScalarGridSpec(
        num_scalar_prefetch=1,                              # flat_idx -> SMEM
        grid=(Bp // tb,),
        in_specs=[
            pl.BlockSpec((tb, D), lambda i, idx: (i, 0)),   # current_node
            pl.BlockSpec((tb, 1), lambda i, idx: (i, 0)),   # gate
            pl.BlockSpec(memory_space=pl.ANY),              # encoded_input rows (HBM)
        ],
        out_specs=pl.BlockSpec((tb, D), lambda i, idx: (i, 0)),
        scratch_shapes=[
            pltpu.VMEM((tb, D), encoded_input.dtype),       # gather buffer
            pltpu.SemaphoreType.DMA((1,)),                  # ONE shared semaphore
        ],
    )
    out = pl.pallas_call(
        _most_recent_gather_kernel,
        out_shape=jax.ShapeDtypeStruct((Bp, D), dtype),
        grid_spec=grid_spec,
        compiler_params=_compiler_params(est),
    )(idx_p, cur_p, gate_p.reshape(Bp, 1), enc_flat)
    return out[:B]


# ----------------------------------------------------------------------------
# Public entry point (mirrors MostRecent.forward)
# ----------------------------------------------------------------------------
def most_recent_forward(current_node, encoded_input, siblings, sibling_mask, *,
                        tb=None, stream_t_max=8):
    """current_node (B, D), encoded_input (B, T, D), siblings / sibling_mask (B, S)."""
    B, T, D = encoded_input.shape
    S = siblings.shape[1]
    tb = _choose_tb(B) if tb is None else max(8, _round_up(tb, 8))

    # Cheap scalar preprocessing in XLA: sibling count and most-recent slot.
    n = jnp.sum(sibling_mask.astype(jnp.int32), axis=1)            # (B,)
    has_sib = n > 0
    last = jnp.where(has_sib, n - 1, S - 1)                        # mirrors PyTorch's -1 wraparound
    msr = jnp.take_along_axis(siblings.astype(jnp.int32), last[:, None], axis=1)[:, 0]

    # Small T: streaming + in-VMEM select beats many sub-KB latency-bound gather
    # DMAs.  The crossover is HBM-bandwidth dependent; 8 is conservative for v5e,
    # raise to ~16-32 on v6e/v7x.
    if T <= stream_t_max or B * T < 8:
        msr_sel = jnp.where(has_sib, msr, -1)                      # -1 sentinel gates for free
        return _forward_stream(current_node, encoded_input, msr_sel, tb)
    return _forward_gather(current_node, encoded_input, msr, has_sib, tb)


if __name__ == "__main__":
    B, T, D, S = 16, 8, 128, 5   # batch, input_seq_len, encoder_dim, sibling slots

    key = jax.random.PRNGKey(0)
    k1, k2, k3, k4 = jax.random.split(key, 4)

    current_node = jax.random.normal(k1, (B, D), dtype=jnp.float32)
    encoded_input = jax.random.normal(k2, (B, T, D), dtype=jnp.float32)
    siblings = jax.random.randint(k3, (B, S), 0, T, dtype=jnp.int32)

    counts = jax.random.randint(k4, (B,), 0, S + 1, dtype=jnp.int32)
    counts = counts.at[1].set(0)   # exercise the "no siblings" gate
    counts = counts.at[0].set(S)   # and the "all slots used" path
    sibling_mask = (jnp.arange(S)[None, :] < counts[:, None]).astype(jnp.int32)

    # Pure-JAX reference mirroring the PyTorch code (incl. the -1 wraparound).
    n = jnp.sum(sibling_mask, axis=1)
    last = jnp.where(n - 1 < 0, S - 1, n - 1)
    msr = siblings[jnp.arange(B), last]
    enc_sib = encoded_input[jnp.arange(B), msr]
    enc_sib = (n != 0).astype(jnp.float32)[:, None] * enc_sib
    ref = current_node + enc_sib

    # Path 1: streaming select (default for T <= 8).
    out_stream = jax.block_until_ready(
        most_recent_forward(current_node, encoded_input, siblings, sibling_mask))
    # Path 2: manual HBM row gather (forced, to exercise the large-T path too).
    out_gather = jax.block_until_ready(
        most_recent_forward(current_node, encoded_input, siblings, sibling_mask,
                            stream_t_max=0))

    assert out_stream.shape == (B, D) and out_gather.shape == (B, D)
    assert jnp.allclose(out_stream, ref, atol=1e-6, rtol=1e-6), "stream path mismatch"
    assert jnp.allclose(out_gather, ref, atol=1e-6, rtol=1e-6), "gather path mismatch"
    print("KERNEL_OK")
</pallas_src>

<mosaic_0001>
module attributes {stable_mosaic.version = 11 : i64} {
  func.func @_most_recent_stream_kernel(%arg0: i32, %arg1: memref<8x1xi32, #tpu.memory_space<vmem>>, %arg2: memref<8x128xf32, #tpu.memory_space<vmem>>, %arg3: memref<8x8x128xf32, #tpu.memory_space<vmem>>, %arg4: memref<8x128xf32, #tpu.memory_space<vmem>>) attributes {dimension_semantics = [#tpu.dimension_semantics<parallel>], iteration_bounds = array<i64: 2>, scalar_prefetch = 0 : i64, scratch_operands = 0 : i64, tpu.core_type = #tpu.core_type<tc>, window_params = [{transform_indices = @transform_0, window_bounds = array<i64: 8, 1>}, {transform_indices = @transform_1, window_bounds = array<i64: 8, 128>}, {transform_indices = @transform_2, window_bounds = array<i64: 8, 8, 128>}, {transform_indices = @transform_3, window_bounds = array<i64: 8, 128>}]} {
    %0 = tpu.iota {dimensions = array<i32: 1>} : vector<8x8x128xi32>
    %c0 = arith.constant 0 : index
    %c0_0 = arith.constant 0 : index
    %1 = vector.load %arg1[%c0, %c0_0] : memref<8x1xi32, #tpu.memory_space<vmem>>, vector<8x1xi32>
    %2 = vector.shape_cast %1 : vector<8x1xi32> to vector<8x1x1xi32>
    %3 = vector.broadcast %2 : vector<8x1x1xi32> to vector<8x8x128xi32>
    %4 = arith.cmpi eq, %0, %3 : vector<8x8x128xi32>
    %c0_1 = arith.constant 0 : index
    %c0_2 = arith.constant 0 : index
    %c0_3 = arith.constant 0 : index
    %5 = vector.load %arg3[%c0_1, %c0_2, %c0_3] : memref<8x8x128xf32, #tpu.memory_space<vmem>>, vector<8x8x128xf32>
    %c0_i32 = arith.constant 0 : i32
    %6 = arith.sitofp %c0_i32 : i32 to f32
    %7 = vector.broadcast %6 : f32 to vector<8x8x128xf32>
    %8 = arith.select %4, %5, %7 : vector<8x8x128xi1>, vector<8x8x128xf32>
    %cst = arith.constant dense<0.000000e+00> : vector<8x128xf32>
    %9 = vector.multi_reduction <add>, %8, %cst [1] : vector<8x8x128xf32> to vector<8x128xf32>
    %c0_4 = arith.constant 0 : index
    %c0_5 = arith.constant 0 : index
    %10 = vector.load %arg2[%c0_4, %c0_5] : memref<8x128xf32, #tpu.memory_space<vmem>>, vector<8x128xf32>
    %11 = arith.addf %10, %9 : vector<8x128xf32>
    %c0_6 = arith.constant 0 : index
    %c0_7 = arith.constant 0 : index
    %12 = vector.load %arg4[%c0_6, %c0_7] : memref<8x128xf32, #tpu.memory_space<vmem>>, vector<8x128xf32>
    tpu.vector_store %arg4[%c0_6, %c0_7], %11 {strides = array<i32>} : memref<8x128xf32, #tpu.memory_space<vmem>>, vector<8x128xf32>,
    return
  }
  func.func @transform_0(%arg0: i32) -> (i32, i32) {
    %c0_i32 = arith.constant 0 : i32
    %c0_i32_0 = arith.constant 0 : i32
    return %arg0, %c0_i32 : i32, i32
  }
  func.func @transform_1(%arg0: i32) -> (i32, i32) {
    %c0_i32 = arith.constant 0 : i32
    %c0_i32_0 = arith.constant 0 : i32
    return %arg0, %c0_i32 : i32, i32
  }
  func.func @transform_2(%arg0: i32) -> (i32, i32, i32) {
    %c0_i32 = arith.constant 0 : i32
    %c0_i32_0 = arith.constant 0 : i32
    %c0_i32_1 = arith.constant 0 : i32
    return %arg0, %c0_i32, %c0_i32_0 : i32, i32, i32
  }
  func.func @transform_3(%arg0: i32) -> (i32, i32) {
    %c0_i32 = arith.constant 0 : i32
    %c0_i32_0 = arith.constant 0 : i32
    return %arg0, %c0_i32 : i32, i32
  }
}

</mosaic_0001>

<bundles_post_ra>
// kernel: tpu_custom_call.1
= control target key start
LH: loop header
LB: loop body
LE: loop exit
PB: predicated region body
PF: predicated region fallthrough
CT: control target
= control target key end

     0   :  { %8 = vsyncpa [#allocation3], 0  ;;  %s829_s0 = inlined_call_operand.vmem [shape: s32[16,1], index: 0, kind: input, shape index: {}]   ;;  %s830_s1 = inlined_call_operand.vmem [shape: f32[16,128], index: 1, kind: input, shape index: {}]   ;;  %s831_s2 = inlined_call_operand.hbm [shape: f32[16,8,128], index: 2, kind: input, shape index: {}]   ;;  %s832_s3 = inlined_call_operand.hbm [shape: f32[16,128], index: 3, kind: output, shape index: {}]  }
   0x1   :  { %10 = vsyncpa [#allocation3 + $0x1], 0 }
   0x2   :  { %11 = vsyncpa [#allocation4], 0 }
   0x3   :  { %13 = vsyncpa [#allocation4 + $0x1], 0  ;;  %s665_s12 = smov 0   ;;  %s667_s13 = smov 0  }
   0x4   :  { %s669_s14 = smov 0   ;;  %s671_s15 = smov 0  }
   0x5 LB: > { %s686_s16 = sadd.s32 4294967295, %s640_s15   ;;  %s476_s17 = sadd.s32 4294967294, %s640_s15   ;;  %s640_s15 = sphi %s671_s15, %s842_s15   ;;  %s636_s14 = sphi %s669_s14, %s841_s14   ;;  %s632_s13 = sphi %s667_s13, %s840_s13   ;;  %s628_s12 = sphi %s665_s12, %s839_s12  }
   0x6   : > { %s690_s18 = sadd.s32 1, %s640_s15   ;;  %s78_s19 = sadd.s32 1, %s636_s14 }
   0x7   : > { %s75_s20 = ssub.s32 %s640_s15, %s690_s18  ;;  %p85_p0 = scmp.ne.s32.totalorder %s636_s14, %s632_s13 }
   0x8   : > { %p76_p1 = scmp.eq.s32.totalorder %s75_s20, 0  ;;  %p86_p2 = scmp.eq.s32.totalorder %s640_s15, 0 }
   0x9   : > { %p91_p3 = scmp.ne.s32.totalorder %s632_s13, %s628_s12  ;;  %p92_p4 = scmp.eq.s32.totalorder %s686_s16, 0 }
   0xa   : > { %s702_s21 = scalar_select %p76_p1, %s636_s14, %s78_s19  }
   0xb   : > { %p704_p5 = por %p86_p2, %p85_p0  ;;  %p708_p6 = por %p92_p4, %p91_p3 }
   0xc   : > { %p115_p7 = scmp.eq.s32.totalorder %s686_s16, 1  ;;  %p121_p8 = scmp.eq.s32.totalorder %s476_s17, 1 }
   0xd   : > { %p504_p10 = scmp.lt.s32.totalorder %s640_s15, 2  ;;  %s155_s26 = sand.u32 1, %s636_s14  }
   0xe   : > { %p715_p11 = por %p115_p7, %p85_p0  ;;  %p719_p12 = por %p121_p8, %p91_p3 }
   0xf   : > { %s491_s27 = sshll.u32 %s640_s15, 6  ;;  %s479_s28 = sshll.u32 %s155_s26, 6 }
  0x10   : > { %s164_s4 = scalar_lea.hbm %s831_s2, %s491_s27  ;;  %s159_s6 = scalar_lea.vmem [#allocation2], %s479_s28 }
  0x11   : > { %s165_s5 = sshll.u32 %s164_s4, 4  ;;  %s167_s7 = sshll.u32 %s159_s6, 4  ;;  %s166_s5 = int_to_ptr.hbm [resolvable:$true] %s165_s5  ;;  %s168_s7 = int_to_ptr.vmem [resolvable:$true] %s167_s7 }
  0x12   : > { %p730_p13 = pnand %p504_p10, %p704_p5  ;;  %p482_p0 = scmp.ge.s32.totalorder %s640_s15, 1 }
  0x13   : > { %p175_p1 = scmp.lt.s32.totalorder %s640_s15, 3  ;;  %s156_s9 = scalar_lea.sflag [#allocation3], %s155_s26 }
  0x14   : > { %s544_s10 = sshra.s32 %s166_s5, 4  ;;  %p548_p3 = pneg %p730_p13  ;;  %s545_s10 = int_to_ptr.hbm [resolvable:$true] %s544_s10 }
  0x15   : > { %s546_s11 = scalar_lea.hbm %s545_s10, 64  ;;  %s551_s20 = scalar_lea.hbm %s831_s2, 128 }
  0x16   : > { %p547_p2 = scmp.ne.s32.totalorder %s545_s10, %s546_s11  ;;  %p552_p5 = scmp.lt.s32.totalorder %s545_s10, %s831_s2 }
  0x17   : > { %p553_p8 = scmp.lt.s32.totalorder %s551_s20, %s546_s11 }
  0x18   : > { %p549_p4 = pnand %p548_p3, %p547_p2 }
  0x19   : > { %p554_p10 = por %p553_p8, %p552_p5 }
  0x1a   : > { %p550_p7 = pneg %p549_p4 }
  0x1c   : > { %p555_p9 = pnand %p554_p10, %p550_p7 }
  0x1e   : > { %558 = shalt.err (!%p555_p9)
}
  0x1f   : > { %s642_s26 = smov 128   ;;  %s643_s28 = smov 8  }
  0x20   : > { %499 = dma.hbm_to_vmem [thread:$0]  (!%p730_p13), %s166_s5, 1024, %s168_s7, %s156_s9, %s642_s26, %s642_s26, %s643_s28  }
  0x21   : > { %p176_p2 = pnand %p482_p0, %p175_p1 }
  0x22   : > { %s751_s29 = sand.u32 (!%p176_p2), 1, %s632_s13  }
  0x23   : > { %179 = sbr.rel (%p176_p2) target bundleno = 203 (0xcb), region = 32  ;;  %s483_s30 = sshll.u32 (!%p176_p2), %s751_s29, 6 }
  0x24   : > { %s182_s4 = scalar_lea.sflag (!%p176_p2), [#allocation3], %s751_s29  ;;  %s755_s6 = scalar_lea.vmem (!%p176_p2), [#allocation2], %s483_s30 }
  0x28   : > { %619 = dma.done.wait (%p708_p6), %s182_s4, 1024  }
  0x29   : > { %621 = vsyncadd (%p708_p6), %s182_s4, 4294966272  ;;  %p217_p9 = scmp.lt.s32.totalorder %s686_s16, 1  ;;  %v644_v0 = vmov 0   ;;  %v226_v18 = vlaneseq  ;;  %v280_v20 = vld [vmem:[%s755_s6 + $0x20] sm:$0xff]  ;;  %v278_v25 = vld [vmem:[%s755_s6 + $0x10] sm:$0xff]  ;;  %vm349_vm7 = vcmask 1041409  }
  0x2a   : > { %541 = vset.pattern.permute.xlu0 %v644_v0  ;;  %542 = vset.pattern.permute.xlu1 %v644_v0  ;;  %v276_v22 = vld [vmem:[%s755_s6] sm:$0xff]  ;;  %v281_v28 = vld [vmem:[%s755_s6 + $0x28] sm:$0xff]  ;;  %v279_v41 = vld [vmem:[%s755_s6 + $0x18] sm:$0xff]  ;;  %vm351_vm9 = vcmask 1042434   ;;  %vm353_vm10 = vcmask 1043459   ;;  %vm355_vm11 = vcmask 1044484  }
  0x2b   : > { %s763_s5 = scalar_select %p217_p9, %s686_s16, 1  ;;  %543 = vset.pattern.permute.xlu2 %v644_v0  ;;  %v771_v19 = vshrl.u32 %v226_v18, 7  ;;  %v277_v37 = vld [vmem:[%s755_s6 + $0x8] sm:$0xff]  ;;  %v282_v56 = vld [vmem:[%s755_s6 + $0x30] sm:$0xff]  ;;  %v283_v62 = vld [vmem:[%s755_s6 + $0x38] sm:$0xff]  ;;  %vm357_vm12 = vcmask 1045509  }
  0x2c   : > { %s484_s23 = sshll.u32 %s751_s29, 3  ;;  %s488_s11 = sshll.u32 %s686_s16, 3  ;;  %vm359_vm13 = vcmask 1046534   ;;  %vm361_vm14 = vcmask 1047559  }
  0x2d   : > { %s485_s7 = sshll.u32 %s763_s5, 3  ;;  %s377_s26 = scalar_lea.hbm %s832_s3, %s488_s11 }
  0x2e   : > { %s220_s10 = scalar_lea.vmem %s829_s0, %s485_s7  ;;  %s224_s20 = scalar_lea.vmem %s830_s1, %s485_s7 }
  0x2f   : > { %v228_v1 = vld [vmem:[%s220_s10] sm:$0xff]  ;;  %s216_s16 = scalar_lea.vmem [#allocation5], %s484_s23  ;;  %s381_s30 = sshll.u32 %s377_s26, 4  ;;  %s382_s30 = int_to_ptr.hbm [resolvable:$true] %s381_s30 }
  0x30   : > { %v236_v2 = vperm.slane %v228_v1, 0  ;;  %v230_v3 = vrot.slane %v228_v1, 2  ;;  %v232_v4 = vrot.slane %v228_v1, 4  ;;  %v229_v6 = vrot.slane %v228_v1, 1  ;;  %s379_s28 = sshll.u32 %s216_s16, 4  ;;  %s367_s4 = scalar_lea.sflag [#allocation4], %s751_s29  ;;  %s380_s28 = int_to_ptr.vmem [resolvable:$true] %s379_s28 }
  0x31   : > { %v231_v8 = vrot.slane %v228_v1, 3  ;;  %v233_v9 = vrot.slane %v228_v1, 5  ;;  %v234_v13 = vrot.slane %v228_v1, 6  ;;  %v235_v14 = vrot.slane %v228_v1, 7  ;;  %s588_s6 = sshra.s32 %s382_s30, 4  ;;  %s594_s9 = scalar_lea.hbm %s832_s3, 16  ;;  %s589_s6 = int_to_ptr.hbm [resolvable:$true] %s588_s6 }
  0x32   : > { %245 = vperm.xlu0 %541, %v236_v2   ;;  %v238_v5 = vperm.slane %v230_v3, 0  ;;  %v240_v7 = vperm.slane %v232_v4, 0  ;;  %v237_v10 = vperm.slane %v229_v6, 0  ;;  %s590_s5 = scalar_lea.hbm %s589_s6, 8  ;;  %p595_p1 = scmp.lt.s32.totalorder %s589_s6, %s832_s3 }
  0x33   : > { %v239_v11 = vperm.slane %v231_v8, 0  ;;  %v241_v12 = vperm.slane %v233_v9, 0  ;;  %v242_v15 = vperm.slane %v234_v13, 0  ;;  %v243_v16 = vperm.slane %v235_v14, 0  ;;  %p591_p6 = scmp.ne.s32.totalorder %s589_s6, %s590_s5  ;;  %p596_p3 = scmp.lt.s32.totalorder %s594_s9, %s590_s5 }
  0x34   : > { %251 = vperm.xlu1 %542, %v238_v5   ;;  %257 = vperm.xlu2 %543, %v240_v7  }
  0x35   : > { %p592_p13 = pnand %p591_p6, %p715_p11  ;;  %p597_p4 = por %p596_p3, %p595_p1 }
  0x37   : > { %p593_p0 = pneg %p592_p13 }
  0x39   : > { %p598_p7 = pnand %p597_p4, %p593_p0 }
  0x3a   : > { %248 = vperm.xlu0 %541, %v237_v10  }
  0x3c   : > { %254 = vperm.xlu1 %542, %v239_v11   ;;  %260 = vperm.xlu2 %543, %v241_v12  }
  0x42   : > { %263 = vperm.xlu0 %541, %v242_v15  }
  0x44   : > { %266 = vperm.xlu1 %542, %v243_v16  }
  0x8e   : > { %v258_v17 = vpop.permute.xlu2 %257 }
  0x8f   : > { %vm272_vm0 = vcmp.eq.s32.totalorder %v771_v19, %v258_v17 }
  0x90   : > { %v288_v21 = vsel %vm272_vm0, %v280_v20, 0.0 }
  0x91   : > { %v316_v26 = vrot.slane %v288_v21, 4 }
  0x93   : > { %v317_v35 = vadd.f32 %v316_v26, %v288_v21 }
  0x95   : > { %v318_v42 = vrot.slane %v317_v35, 2 }
  0x96   : > { %v261_v23 = vpop.permute.xlu2 %260 }
  0x97   : > { %vm273_vm2 = vcmp.eq.s32.totalorder %v771_v19, %v261_v23  ;;  %v319_v52 = vadd.f32 %v318_v42, %v317_v35 }
  0x98   : > { %v289_v33 = vsel %vm273_vm2, %v281_v28, 0.0 }
  0x99   : > { %v322_v39 = vrot.slane %v289_v33, 4  ;;  %v320_v63 = vrot.slane %v319_v52, 1 }
  0x9b   : > { %v323_v48 = vadd.f32 %v322_v39, %v289_v33  ;;  %v321_v20 = vadd.f32 %v320_v63, %v319_v52  ;;  %v340_v33 = vld [vmem:[%s224_s20] sm:$0xff] }
  0x9d   : > { %v324_v58 = vrot.slane %v323_v48, 2 }
  0x9f   : > { %v325_v7 = vadd.f32 %v324_v58, %v323_v48 }
  0xa1   : > { %v326_v18 = vrot.slane %v325_v7, 1 }
  0xa4   : > { %v246_v24 = vpop.permute.xlu0 %245 }
  0xa5   : > { %vm268_vm1 = vcmp.eq.s32.totalorder %v771_v19, %v246_v24 }
  0xa6   : > { %v284_v27 = vsel %vm268_vm1, %v276_v22, 0.0  ;;  %v252_v29 = vpop.permute.xlu1 %251 }
  0xa7   : > { %v292_v30 = vrot.slane %v284_v27, 4  ;;  %vm270_vm3 = vcmp.eq.s32.totalorder %v771_v19, %v252_v29 }
  0xa8   : > { %v286_v31 = vsel %vm270_vm3, %v278_v25, 0.0 }
  0xa9   : > { %v293_v32 = vadd.f32 %v292_v30, %v284_v27  ;;  %v304_v34 = vrot.slane %v286_v31, 4  ;;  %v327_v27 = vadd.f32 %v326_v18, %v325_v7 }
  0xab   : > { %v305_v36 = vadd.f32 %v304_v34, %v286_v31  ;;  %v294_v38 = vrot.slane %v293_v32, 2 }
  0xac   : > { %v249_v40 = vpop.permute.xlu0 %248 }
  0xad   : > { %vm269_vm4 = vcmp.eq.s32.totalorder %v771_v19, %v249_v40  ;;  %v306_v43 = vrot.slane %v305_v36, 2  ;;  %v295_v47 = vadd.f32 %v294_v38, %v293_v32 }
  0xae   : > { %v285_v44 = vsel %vm269_vm4, %v277_v37, 0.0  ;;  %v255_v45 = vpop.permute.xlu1 %254 }
  0xaf   : > { %v298_v46 = vrot.slane %v285_v44, 4  ;;  %vm271_vm5 = vcmp.eq.s32.totalorder %v771_v19, %v255_v45  ;;  %v307_v53 = vadd.f32 %v306_v43, %v305_v36  ;;  %v296_v57 = vrot.slane %v295_v47, 1 }
  0xb0   : > { %v287_v49 = vsel %vm271_vm5, %v279_v41, 0.0 }
  0xb1   : > { %v299_v50 = vadd.f32 %v298_v46, %v285_v44  ;;  %v310_v51 = vrot.slane %v287_v49, 4  ;;  %v308_v0 = vrot.slane %v307_v53, 1  ;;  %v297_v6 = vadd.f32 %v296_v57, %v295_v47 }
  0xb3   : > { %v300_v54 = vrot.slane %v299_v50, 2  ;;  %v311_v55 = vadd.f32 %v310_v51, %v287_v49  ;;  %v309_v13 = vadd.f32 %v308_v0, %v307_v53 }
  0xb4   : > { %v264_v59 = vpop.permute.xlu0 %263 }
  0xb5   : > { %v301_v60 = vadd.f32 %v300_v54, %v299_v50  ;;  %v312_v61 = vrot.slane %v311_v55, 2  ;;  %vm274_vm6 = vcmp.eq.s32.totalorder %v771_v19, %v264_v59 }
  0xb6   : > { %v290_v1 = vsel %vm274_vm6, %v282_v56, 0.0  ;;  %v267_v2 = vpop.permute.xlu1 %266 }
  0xb7   : > { %v302_v3 = vrot.slane %v301_v60, 1  ;;  %v313_v4 = vadd.f32 %v312_v61, %v311_v55  ;;  %v328_v5 = vrot.slane %v290_v1, 4  ;;  %vm275_vm8 = vcmp.eq.s32.totalorder %v771_v19, %v267_v2 }
  0xb8   : > { %v291_v8 = vsel %vm275_vm8, %v283_v62, 0.0 }
  0xb9   : > { %v303_v9 = vadd.f32 %v302_v3, %v301_v60  ;;  %v314_v10 = vrot.slane %v313_v4, 1  ;;  %v329_v11 = vadd.f32 %v328_v5, %v290_v1  ;;  %v334_v12 = vrot.slane %v291_v8, 4 }
  0xbb   : > { %v350_v14 = vsel %vm349_vm7, %v303_v9, %v297_v6  ;;  %v315_v15 = vadd.f32 %v314_v10, %v313_v4  ;;  %v330_v16 = vrot.slane %v329_v11, 2  ;;  %v335_v17 = vadd.f32 %v334_v12, %v291_v8 }
  0xbc   : > { %v352_v19 = vsel %vm351_vm9, %v309_v13, %v350_v14 }
  0xbd   : > { %v354_v21 = vsel %vm353_vm10, %v315_v15, %v352_v19  ;;  %v331_v22 = vadd.f32 %v330_v16, %v329_v11  ;;  %v336_v23 = vrot.slane %v335_v17, 2 }
  0xbe   : > { %v356_v24 = vsel %vm355_vm11, %v321_v20, %v354_v21 }
  0xbf   : > { %v332_v25 = vrot.slane %v331_v22, 1  ;;  %v337_v26 = vadd.f32 %v336_v23, %v335_v17  ;;  %v358_v30 = vsel %vm357_vm12, %v327_v27, %v356_v24 }
  0xc1   : > { %v333_v28 = vadd.f32 %v332_v25, %v331_v22  ;;  %v338_v29 = vrot.slane %v337_v26, 1 }
  0xc3   : > { %v360_v31 = vsel %vm359_vm13, %v333_v28, %v358_v30  ;;  %v339_v32 = vadd.f32 %v338_v29, %v337_v26 }
  0xc5   : > { %v362_v34 = vsel %vm361_vm14, %v339_v32, %v360_v31 }
  0xc6   : > { %v364_v35 = vadd.f32 %v362_v34, %v340_v33 }
  0xc8   : > { %365 = vst [vmem:[%s216_s16] sm:$0xff] %v364_v35 }
  0xc9   : > { %601 = shalt.err (!%p598_p7)
}
  0xca   : > { %494 = dma.vmem_to_hbm [thread:$0]  (%p715_p11), %s380_s28, 128, %s382_s30, %s367_s4  }
  0xcb PF: > { %s393_s29 = sand.u32 1, %s628_s12   ;;  %p838_p5 = scmp.ge.s32.totalorder %s640_s15, 2 }
  0xcc   : > { %s394_s11 = scalar_lea.sflag [#allocation4], %s393_s29 }
  0xcd   : > { %p501_p8 = pnand %p838_p5, %p719_p12 }
  0xcf   : > { %p502_p10 = pneg %p501_p8 }
  0xd1   : > { %623 = dma.done.wait (%p502_p10), %s394_s11, 128  }
  0xd2   : > { %625 = vsyncadd (%p502_p10), %s394_s11, 4294967168  ;;  %p16_p2 = scmp.ge.s32.totalorder %s690_s18, 4   ;;  %s839_s12 = smov %s632_s13 }
  0xd3   : > { %s840_s13 = smov %s636_s14  ;;  %s841_s14 = smov %s702_s21 }
  0xd4   : > { %s842_s15 = smov %s690_s18  ;;  %18 = sbr.rel (!%p16_p2) target bundleno = 5 (0x5), region = 83 }
  0xd9   :  { %400 = vsyncpa [#allocation3], 1 }
  0xda   :  { %402 = vsyncpa [#allocation3 + $0x1], 1 }
  0xdb   :  { %403 = vsyncpa [#allocation4], 1 }
  0xdc   :  { %405 = vsyncpa [#allocation4 + $0x1], 1 }

</bundles_post_ra>
